<compile_context>
chip_gen: v7x
topology: tpu7x:2x2x1
jax: 0.10.0
libtpu: 0.0.40
codegen_flags: <defaults>
</compile_context>

<pallas_src>
import jax
import jax.numpy as jnp
from jax.experimental import pallas as pl
from jax.experimental.pallas import tpu as pltpu


def relu_conv1x1_kernel(x_ref, w_ref, o_ref):
    # x_ref: (C_in, H*W) f32 activation tile (NCHW-flattened, no transpose)
    # w_ref: (C_out, C_in) bf16 weight tile (resident across the grid)
    # o_ref: (C_out, H*W) f32 output tile
    x = jnp.maximum(x_ref[...], 0.0)                 # fused ReLU in f32 (VPU, v5e-safe)
    x = x.astype(w_ref.dtype)                        # downcast AFTER ReLU -> bf16 for MXU
    o_ref[...] = jnp.dot(
        w_ref[...], x, preferred_element_type=jnp.float32   # 1x1 conv == matmul (MXU, f32 acc)
    ).astype(o_ref.dtype)


@jax.jit
def relu_conv1x1(x_nchw, weight_oihw):
    """x_nchw: (N, C_in, H, W) float32; weight_oihw: (C_out, C_in, 1, 1) float32."""
    N, C_in, H, W = x_nchw.shape
    C_out = weight_oihw.shape[0]
    HW = H * W

    # Free reshapes only -- no NCHW<->NHWC transposes, no extra HBM round trips.
    x_flat = x_nchw.reshape(N, C_in, HW)
    # Weight -> (C_out, C_in) in bf16.  For a fixed inference weight this cast
    # should be hoisted / constant-folded out of the per-call path by the caller.
    w_mat = weight_oihw.reshape(C_out, C_in).astype(jnp.bfloat16)

    cost = pl.CostEstimate(
        flops=2 * N * HW * C_in * C_out,
        transcendentals=0,
        bytes_accessed=(N * C_in * HW * 4) + (C_out * C_in * 2) + (N * C_out * HW * 4),
    )

    out_flat = pl.pallas_call(
        relu_conv1x1_kernel,
        out_shape=jax.ShapeDtypeStruct((N, C_out, HW), x_nchw.dtype),
        grid_spec=pltpu.PrefetchScalarGridSpec(
            num_scalar_prefetch=0,
            grid=(N,),
            in_specs=[
                # Activation: one batch element per grid step (batch dim squeezed).
                pl.BlockSpec((pl.Squeezed(), C_in, HW), lambda n: (n, 0, 0)),
                # Weight: same block every step -> DMA'd once, stays resident in VMEM.
                pl.BlockSpec((C_out, C_in), lambda n: (0, 0)),
            ],
            out_specs=pl.BlockSpec((pl.Squeezed(), C_out, HW), lambda n: (n, 0, 0)),
        ),
        compiler_params=pltpu.CompilerParams(
            # Batch elements are independent -> allow megacore sharding (no-op at N=1).
            dimension_semantics=("parallel",),
        ),
        cost_estimate=cost,
    )(x_flat, w_mat)

    # Free reshape back to NCHW.
    return out_flat.reshape(N, C_out, H, W)


if __name__ == "__main__":
    key = jax.random.PRNGKey(0)
    kx, kw = jax.random.split(key)

    # Shapes implied by the module: input [1, 768, 7, 7], conv weight [128, 768, 1, 1]
    x = jax.random.normal(kx, (1, 768, 7, 7), dtype=jnp.float32)
    w = jax.random.normal(kw, (128, 768, 1, 1), dtype=jnp.float32) * 0.02

    out = relu_conv1x1(x, w)
    jax.block_until_ready(out)

    # Sanity check against plain-JAX f32 reference of the same math.
    # Tolerance relaxed because the matmul operands are bf16 (f32 accumulation).
    x_relu = jnp.maximum(x, 0.0)
    ref = jnp.einsum("nchw,oc->nohw", x_relu, w.reshape(128, 768))
    assert out.shape == (1, 128, 7, 7)
    assert jnp.allclose(out, ref, atol=2e-2, rtol=2e-2)

    print("KERNEL_OK")
</pallas_src>

<mosaic_0001>
module attributes {stable_mosaic.version = 11 : i64} {
  func.func @relu_conv1x1_kernel(%arg0: i32, %arg1: memref<1x768x49xf32, #tpu.memory_space<vmem>>, %arg2: memref<128x768xbf16, #tpu.memory_space<vmem>>, %arg3: memref<1x128x49xf32, #tpu.memory_space<vmem>>) attributes {dimension_semantics = [#tpu.dimension_semantics<parallel>], iteration_bounds = array<i64: 1>, scalar_prefetch = 0 : i64, scratch_operands = 0 : i64, tpu.core_type = #tpu.core_type<tc>, window_params = [{transform_indices = @transform_0, window_bounds = array<i64: 1, 768, 49>}, {pipeline_mode = #tpu.pipeline_mode<synchronous>, transform_indices = @transform_1, window_bounds = array<i64: 128, 768>}, {transform_indices = @transform_2, window_bounds = array<i64: 1, 128, 49>}]} {
    %c0 = arith.constant 0 : index
    %c0_0 = arith.constant 0 : index
    %c0_1 = arith.constant 0 : index
    %0 = vector.load %arg1[%c0, %c0_0, %c0_1] : memref<1x768x49xf32, #tpu.memory_space<vmem>>, vector<1x768x49xf32>
    %1 = vector.shape_cast %0 : vector<1x768x49xf32> to vector<768x49xf32>
    %cst = arith.constant 0.000000e+00 : f32
    %2 = vector.broadcast %cst : f32 to vector<768x49xf32>
    %3 = arith.maximumf %1, %2 : vector<768x49xf32>
    %4 = arith.truncf %3 : vector<768x49xf32> to vector<768x49xbf16>
    %c0_2 = arith.constant 0 : index
    %c0_3 = arith.constant 0 : index
    %5 = vector.load %arg2[%c0_2, %c0_3] : memref<128x768xbf16, #tpu.memory_space<vmem>>, vector<128x768xbf16>
    %cst_4 = arith.constant dense<0.000000e+00> : vector<128x49xf32>
    %6 = tpu.matmul %5, %4, %cst_4 {dimension_numbers = #tpu.dot_dimension_numbers<[1], [0], [0], [1], [0, 0, 1, 1], [], []>} : vector<128x768xbf16>, vector<768x49xbf16>, vector<128x49xf32> -> vector<128x49xf32>
    %c0_5 = arith.constant 0 : index
    %c0_6 = arith.constant 0 : index
    %c0_7 = arith.constant 0 : index
    %7 = vector.load %arg3[%c0_5, %c0_6, %c0_7] : memref<1x128x49xf32, #tpu.memory_space<vmem>>, vector<1x128x49xf32>
    %8 = vector.shape_cast %7 : vector<1x128x49xf32> to vector<128x49xf32>
    %9 = vector.shape_cast %6 : vector<128x49xf32> to vector<1x128x49xf32>
    tpu.vector_store %arg3[%c0_5, %c0_6, %c0_7], %9 {strides = array<i32>} : memref<1x128x49xf32, #tpu.memory_space<vmem>>, vector<1x128x49xf32>,
    return
  }
  func.func @transform_0(%arg0: i32) -> (i32, i32, i32) {
    %c0_i32 = arith.constant 0 : i32
    %c0_i32_0 = arith.constant 0 : i32
    %c0_i32_1 = arith.constant 0 : i32
    return %arg0, %c0_i32, %c0_i32_0 : i32, i32, i32
  }
  func.func @transform_1(%arg0: i32) -> (i32, i32) {
    %c0_i32 = arith.constant 0 : i32
    %c0_i32_0 = arith.constant 0 : i32
    %c0_i32_1 = arith.constant 0 : i32
    return %c0_i32, %c0_i32_0 : i32, i32
  }
  func.func @transform_2(%arg0: i32) -> (i32, i32, i32) {
    %c0_i32 = arith.constant 0 : i32
    %c0_i32_0 = arith.constant 0 : i32
    %c0_i32_1 = arith.constant 0 : i32
    return %arg0, %c0_i32, %c0_i32_0 : i32, i32, i32
  }
}

</mosaic_0001>

<bundles_post_ra>
// kernel: relu_conv1x1.1
= control target key start
LH: loop header
LB: loop body
LE: loop exit
PB: predicated region body
PF: predicated region fallthrough
CT: control target
= control target key end

     0   :  { %vm831_vm0 = vcmask 400384   ;;  %s1751_s0 = inlined_call_operand.vmem [shape: f32[1,768,49], index: 0, kind: input, shape index: {}]   ;;  %s1752_s1 = inlined_call_operand.vmem [shape: bf16[128,768], index: 1, kind: input, shape index: {}]   ;;  %s1753_s2 = inlined_call_operand.vmem [shape: f32[1,128,49], index: 2, kind: output, shape index: {}]  }
   0x1   :  { %v28_v0 = vld [vmem:[%s1751_s0 + $0x80] sm:$0xff]  ;;  %v29_v1 = vld [vmem:[%s1751_s0 + $0x88] sm:$0xff]  ;;  %v30_v7 = vld [vmem:[%s1751_s0 + $0x90] sm:$0xff] }
   0x2   :  { %v12_v2 = vld [vmem:[%s1751_s0] sm:$0xff]  ;;  %v124_v3 = vmax.f32 %v28_v0, 0.0  ;;  %v125_v4 = vmax.f32 %v29_v1, 0.0  ;;  %v13_v5 = vld [vmem:[%s1751_s0 + $0x8] sm:$0xff]  ;;  %v31_v8 = vld [vmem:[%s1751_s0 + $0x98] sm:$0xff]  ;;  %v126_v10 = vmax.f32 %v30_v7, 0.0 }
   0x3   :  { %v108_v6 = vmax.f32 %v12_v2, 0.0  ;;  %v109_v9 = vmax.f32 %v13_v5, 0.0  ;;  %v127_v11 = vmax.f32 %v31_v8, 0.0  ;;  %v14_v12 = vld [vmem:[%s1751_s0 + $0x10] sm:$0xff]  ;;  %v15_v13 = vld [vmem:[%s1751_s0 + $0x18] sm:$0xff]  ;;  %v32_v14 = vld [vmem:[%s1751_s0 + $0xa0] sm:$0xff] }
   0x4   :  { %v212_v15 = vpack.c.bf16 %v125_v4, %v124_v3  ;;  %v110_v16 = vmax.f32 %v14_v12, 0.0  ;;  %v111_v17 = vmax.f32 %v15_v13, 0.0  ;;  %v33_v18 = vld [vmem:[%s1751_s0 + $0xa8] sm:$0xff]  ;;  %v128_v19 = vmax.f32 %v32_v14, 0.0  ;;  %v16_v20 = vld [vmem:[%s1751_s0 + $0x20] sm:$0xff]  ;;  %v34_v25 = vld [vmem:[%s1751_s0 + $0xb0] sm:$0xff] }
   0x5   :  { %v17_v21 = vld [vmem:[%s1751_s0 + $0x28] sm:$0xff]  ;;  %v204_v22 = vpack.c.bf16 %v109_v9, %v108_v6  ;;  %v213_v23 = vpack.c.bf16 %v127_v11, %v126_v10  ;;  %v129_v24 = vmax.f32 %v33_v18, 0.0  ;;  %v35_v26 = vld [vmem:[%s1751_s0 + $0xb8] sm:$0xff]  ;;  %v112_v28 = vmax.f32 %v16_v20, 0.0  ;;  %v18_v33 = vld [vmem:[%s1751_s0 + $0x30] sm:$0xff] }
   0x6   :  { %900 = vmatprep.subr.bf16.mxu0 %v212_v15  ;;  %1092 = vmatprep.subr.bf16.mxu1 %v212_v15  ;;  %v205_v27 = vpack.c.bf16 %v111_v17, %v110_v16  ;;  %v113_v29 = vmax.f32 %v17_v21, 0.0  ;;  %v130_v31 = vmax.f32 %v34_v25, 0.0  ;;  %v131_v32 = vmax.f32 %v35_v26, 0.0  ;;  %v19_v34 = vld [vmem:[%s1751_s0 + $0x38] sm:$0xff]  ;;  %v36_v35 = vld [vmem:[%s1751_s0 + $0xc0] sm:$0xff]  ;;  %v37_v36 = vld [vmem:[%s1751_s0 + $0xc8] sm:$0xff] }
   0x7   :  { %901 = vmatpush3.bf16.msra.mxu0 %v204_v22  ;;  %1100 = vmatpush3.bf16.msra.mxu1 %v204_v22  ;;  %v214_v30 = vpack.c.bf16 %v129_v24, %v128_v19  ;;  %v114_v38 = vmax.f32 %v18_v33, 0.0  ;;  %v115_v39 = vmax.f32 %v19_v34, 0.0  ;;  %v20_v40 = vld [vmem:[%s1751_s0 + $0x40] sm:$0xff]  ;;  %v21_v41 = vld [vmem:[%s1751_s0 + $0x48] sm:$0xff]  ;;  %v132_v43 = vmax.f32 %v36_v35, 0.0  ;;  %v38_v45 = vld [vmem:[%s1751_s0 + $0xd0] sm:$0xff] }
   0x8   :  { %902 = vmatprep.subr.bf16.mxu0 %v213_v23  ;;  %1093 = vmatprep.subr.bf16.mxu1 %v213_v23  ;;  %v206_v37 = vpack.c.bf16 %v113_v29, %v112_v28  ;;  %v215_v42 = vpack.c.bf16 %v131_v32, %v130_v31  ;;  %v133_v44 = vmax.f32 %v37_v36, 0.0  ;;  %v39_v46 = vld [vmem:[%s1751_s0 + $0xd8] sm:$0xff]  ;;  %v116_v50 = vmax.f32 %v20_v40, 0.0  ;;  %v22_v55 = vld [vmem:[%s1751_s0 + $0x50] sm:$0xff]  ;;  %v40_v57 = vld [vmem:[%s1751_s0 + $0xe0] sm:$0xff] }
   0x9   :  { %v1110_v47 = vld [vmem:[%s1752_s1 + $0x4] ss:$24 sps:$4 sm:$0xff]   ;;  %v207_v49 = vpack.c.bf16 %v115_v39, %v114_v38  ;;  %v117_v51 = vmax.f32 %v21_v41, 0.0  ;;  %v134_v53 = vmax.f32 %v38_v45, 0.0  ;;  %v135_v54 = vmax.f32 %v39_v46, 0.0  ;;  %v41_v58 = vld [vmem:[%s1751_s0 + $0xe8] sm:$0xff] }
   0xa   :  { %v1113_v48 = vld [vmem:[%s1752_s1 + $0xc4] ss:$24 sps:$4 sm:$0xff]   ;;  %v216_v52 = vpack.c.bf16 %v133_v44, %v132_v43  ;;  %572 = vmatprep.mubr.bf16.mxu0 %v1110_v47  ;;  %v118_v60 = vmax.f32 %v22_v55, 0.0  ;;  %v25_v63 = vld [vmem:[%s1751_s0 + $0x68] sm:$0xff]  ;;  %v136_v1 = vmax.f32 %v40_v57, 0.0  ;;  %v137_v2 = vmax.f32 %v41_v58, 0.0 }
   0xb   :  { %903 = vmatpush3.bf16.msra.mxu0 %v205_v27  ;;  %1101 = vmatpush3.bf16.msra.mxu1 %v205_v27  ;;  %v23_v56 = vld [vmem:[%s1751_s0 + $0x58] sm:$0xff]  ;;  %v208_v59 = vpack.c.bf16 %v117_v51, %v116_v50  ;;  %v24_v62 = vld [vmem:[%s1751_s0 + $0x60] sm:$0xff]  ;;  %v217_v0 = vpack.c.bf16 %v135_v54, %v134_v53  ;;  %v42_v3 = vld [vmem:[%s1751_s0 + $0xf0] sm:$0xff]  ;;  %v121_v7 = vmax.f32 %v25_v63, 0.0 }
   0xc   :  { %904 = vmatprep.subr.bf16.mxu0 %v214_v30  ;;  %1094 = vmatprep.subr.bf16.mxu1 %v214_v30  ;;  %v119_v61 = vmax.f32 %v23_v56, 0.0  ;;  %v43_v4 = vld [vmem:[%s1751_s0 + $0xf8] sm:$0xff]  ;;  %v120_v6 = vmax.f32 %v24_v62, 0.0  ;;  %v26_v8 = vld [vmem:[%s1751_s0 + $0x70] sm:$0xff]  ;;  %v60_v10 = vld [vmem:[%s1751_s0 + $0x180] sm:$0xff]  ;;  %v218_v11 = vpack.c.bf16 %v137_v2, %v136_v1  ;;  %v138_v12 = vmax.f32 %v42_v3, 0.0 }
   0xd   :  { %604 = vmatprep.mubr.bf16.mxu1 %v1113_v48  ;;  %v27_v9 = vld [vmem:[%s1751_s0 + $0x78] sm:$0xff]  ;;  %v139_v13 = vmax.f32 %v43_v4, 0.0  ;;  %v61_v14 = vld [vmem:[%s1751_s0 + $0x188] sm:$0xff]  ;;  %v92_v15 = vld [vmem:[%s1751_s0 + $0x280] sm:$0xff]  ;;  %v122_v17 = vmax.f32 %v26_v8, 0.0  ;;  %v156_v19 = vmax.f32 %v60_v10, 0.0 }
   0xe   :  { %v209_v5 = vpack.c.bf16 %v119_v61, %v118_v60  ;;  %v93_v16 = vld [vmem:[%s1751_s0 + $0x288] sm:$0xff]  ;;  %v123_v18 = vmax.f32 %v27_v9, 0.0  ;;  %v44_v20 = vld [vmem:[%s1751_s0 + $0x100] sm:$0xff]  ;;  %v210_v23 = vpack.c.bf16 %v121_v7, %v120_v6  ;;  %v157_v24 = vmax.f32 %v61_v14, 0.0  ;;  %v62_v28 = vld [vmem:[%s1751_s0 + $0x190] sm:$0xff] }
   0xf   :  { %905 = vmatpush3.bf16.msra.mxu0 %v206_v37  ;;  %1102 = vmatpush3.bf16.msra.mxu1 %v206_v37  ;;  %v45_v21 = vld [vmem:[%s1751_s0 + $0x108] sm:$0xff]  ;;  %v76_v22 = vld [vmem:[%s1751_s0 + $0x200] sm:$0xff]  ;;  %v188_v25 = vmax.f32 %v92_v15, 0.0  ;;  %v189_v26 = vmax.f32 %v93_v16, 0.0  ;;  %v63_v29 = vld [vmem:[%s1751_s0 + $0x198] sm:$0xff]  ;;  %v219_v30 = vpack.c.bf16 %v139_v13, %v138_v12  ;;  %v140_v34 = vmax.f32 %v44_v20, 0.0 }
  0x10   :  { %906 = vmatprep.subr.bf16.mxu0 %v215_v42  ;;  %1095 = vmatprep.subr.bf16.mxu1 %v215_v42  ;;  %v77_v27 = vld [vmem:[%s1751_s0 + $0x208] sm:$0xff]  ;;  %v94_v31 = vld [vmem:[%s1751_s0 + $0x290] sm:$0xff]  ;;  %v95_v32 = vld [vmem:[%s1751_s0 + $0x298] sm:$0xff]  ;;  %v211_v33 = vpack.c.bf16 %v123_v18, %v122_v17  ;;  %v141_v35 = vmax.f32 %v45_v21, 0.0  ;;  %v228_v37 = vpack.c.bf16 %v157_v24, %v156_v19  ;;  %v172_v39 = vmax.f32 %v76_v22, 0.0 }
  0x11   :  { %v46_v36 = vld [vmem:[%s1751_s0 + $0x110] sm:$0xff]  ;;  %v244_v38 = vpack.c.bf16 %v189_v26, %v188_v25  ;;  %v173_v40 = vmax.f32 %v77_v27, 0.0  ;;  %v47_v41 = vld [vmem:[%s1751_s0 + $0x118] sm:$0xff]  ;;  %v158_v45 = vmax.f32 %v62_v28, 0.0  ;;  %v159_v46 = vmax.f32 %v63_v29, 0.0  ;;  %v65_v50 = vld [vmem:[%s1751_s0 + $0x1a8] sm:$0xff] }
  0x12   :  { %v78_v42 = vld [vmem:[%s1751_s0 + $0x210] sm:$0xff]  ;;  %v79_v43 = vld [vmem:[%s1751_s0 + $0x218] sm:$0xff]  ;;  %v190_v47 = vmax.f32 %v94_v31, 0.0  ;;  %v191_v48 = vmax.f32 %v95_v32, 0.0  ;;  %v96_v53 = vld [vmem:[%s1751_s0 + $0x2a0] sm:$0xff]  ;;  %v143_v55 = vmax.f32 %v47_v41, 0.0  ;;  %v220_v61 = vpack.c.bf16 %v141_v35, %v140_v34 }
  0x13   :  { %907 = vmatpush3.bf16.msra.mxu0 %v207_v49  ;;  %1103 = vmatpush3.bf16.msra.mxu1 %v207_v49  ;;  %v1108_v44 = vld [vmem:[%s1752_s1] ss:$24 sps:$4 sm:$0xff]   ;;  %v97_v54 = vld [vmem:[%s1751_s0 + $0x2a8] sm:$0xff]  ;;  %v174_v56 = vmax.f32 %v78_v42, 0.0  ;;  %v175_v57 = vmax.f32 %v79_v43, 0.0  ;;  %v236_v62 = vpack.c.bf16 %v173_v40, %v172_v39  ;;  %v161_v2 = vmax.f32 %v65_v50, 0.0 }
  0x14   :  { %908 = vmatprep.subr.bf16.mxu0 %v216_v52  ;;  %1096 = vmatprep.subr.bf16.mxu1 %v216_v52  ;;  %v64_v49 = vld [vmem:[%s1751_s0 + $0x1a0] sm:$0xff]  ;;  %v142_v52 = vmax.f32 %v46_v36, 0.0  ;;  %v1114_v63 = vld [vmem:[%s1752_s1 + $0x34] ss:$24 sps:$4 sm:$0xff]   ;;  %v229_v6 = vpack.c.bf16 %v159_v46, %v158_v45  ;;  %v245_v7 = vpack.c.bf16 %v191_v48, %v190_v47  ;;  %v192_v8 = vmax.f32 %v96_v53, 0.0  ;;  %v51_v21 = vld [vmem:[%s1751_s0 + $0x138] sm:$0xff] }
  0x15   :  { %v1111_v51 = vld [vmem:[%s1752_s1 + $0xc0] ss:$24 sps:$4 sm:$0xff]   ;;  %v160_v1 = vmax.f32 %v64_v49, 0.0  ;;  %v81_v3 = vld [vmem:[%s1751_s0 + $0x228] sm:$0xff]  ;;  %v1390_v4 = vld [vmem:[%s1751_s0 + $0x1b0] sm:$0xff]  ;;  %v193_v9 = vmax.f32 %v97_v54, 0.0  ;;  %v237_v13 = vpack.c.bf16 %v175_v57, %v174_v56 }
  0x16   :  { %v1366_v58 = vld [vmem:[%s1751_s0 + $0x120] sm:$0xff]  ;;  %v98_v10 = vld [vmem:[%s1751_s0 + $0x2b0] sm:$0xff]  ;;  %v221_v12 = vpack.c.bf16 %v143_v55, %v142_v52  ;;  %v177_v19 = vmax.f32 %v81_v3, 0.0  ;;  %v162_v20 = vmax.f32 %v1390_v4, 0.0  ;;  %v69_v31 = vld [vmem:[%s1751_s0 + $0x1c8] sm:$0xff] }
  0x17   :  { %909 = vmatpush3.bf16.msra.mxu0 %v208_v59  ;;  %1104 = vmatpush3.bf16.msra.mxu1 %v208_v59  ;;  %v1371_v59 = vld [vmem:[%s1751_s0 + $0x128] sm:$0xff]  ;;  %v1376_v60 = vld [vmem:[%s1751_s0 + $0x220] sm:$0xff]  ;;  %v144_v14 = vmax.f32 %v1366_v58, 0.0  ;;  %v50_v16 = vld [vmem:[%s1751_s0 + $0x130] sm:$0xff]  ;;  %v230_v17 = vpack.c.bf16 %v161_v2, %v160_v1  ;;  %v246_v26 = vpack.c.bf16 %v193_v9, %v192_v8  ;;  %v194_v28 = vmax.f32 %v98_v10, 0.0 }
  0x18   :  { %910 = vmatprep.subr.bf16.mxu0 %v217_v0  ;;  %1097 = vmatprep.subr.bf16.mxu1 %v217_v0  ;;  %v1116_v0 = vld [vmem:[%s1752_s1 + $0xf4] ss:$24 sps:$4 sm:$0xff]   ;;  %v145_v15 = vmax.f32 %v1371_v59, 0.0  ;;  %v176_v18 = vmax.f32 %v1376_v60, 0.0  ;;  %v1118_v24 = vld [vmem:[%s1752_s1 + $0x30] ss:$24 sps:$4 sm:$0xff]  }
  0x19   :  { %v82_v22 = vld [vmem:[%s1751_s0 + $0x230] sm:$0xff]  ;;  %v100_v32 = vld [vmem:[%s1751_s0 + $0x2c0] sm:$0xff]  ;;  %v101_v34 = vld [vmem:[%s1751_s0 + $0x2c8] sm:$0xff]  ;;  %v165_v48 = vmax.f32 %v69_v31, 0.0 }
  0x1a   :  { %v1119_v25 = vld [vmem:[%s1752_s1 + $0xf0] ss:$24 sps:$4 sm:$0xff]   ;;  %v52_v35 = vld [vmem:[%s1751_s0 + $0x140] sm:$0xff]  ;;  %v222_v43 = vpack.c.bf16 %v145_v15, %v144_v14  ;;  %v71_v49 = vld [vmem:[%s1751_s0 + $0x1d8] sm:$0xff]  ;;  %v196_v54 = vmax.f32 %v100_v32, 0.0  ;;  %v197_v55 = vmax.f32 %v101_v34, 0.0 }
  0x1b   :  { %911 = vmatpush3.bf16.msra.mxu0 %v209_v5  ;;  %1105 = vmatpush3.bf16.msra.mxu1 %v209_v5  ;;  %v67_v5 = vld [vmem:[%s1751_s0 + $0x1b8] sm:$0xff]  ;;  %v53_v36 = vld [vmem:[%s1751_s0 + $0x148] sm:$0xff]  ;;  %v84_v40 = vld [vmem:[%s1751_s0 + $0x240] sm:$0xff]  ;;  %v167_v9 = vmax.f32 %v71_v49, 0.0 }
  0x1c   :  { %912 = vmatprep.subr.bf16.mxu0 %v218_v11  ;;  %1098 = vmatprep.subr.bf16.mxu1 %v218_v11  ;;  %v99_v11 = vld [vmem:[%s1751_s0 + $0x2b8] sm:$0xff]  ;;  %v163_v27 = vmax.f32 %v67_v5, 0.0  ;;  %v85_v41 = vld [vmem:[%s1751_s0 + $0x248] sm:$0xff]  ;;  %v1450_v42 = vld [vmem:[%s1751_s0 + $0x1d0] sm:$0xff]  ;;  %v180_v2 = vmax.f32 %v84_v40, 0.0  ;;  %v248_v8 = vpack.c.bf16 %v197_v55, %v196_v54 }
  0x1d   :  { %v195_v29 = vmax.f32 %v99_v11, 0.0  ;;  %v1120_v45 = vld [vmem:[%s1752_s1 + $0x64] ss:$24 sps:$4 sm:$0xff]   ;;  %v102_v50 = vld [vmem:[%s1751_s0 + $0x2d0] sm:$0xff]  ;;  %v181_v3 = vmax.f32 %v85_v41, 0.0  ;;  %v166_v4 = vmax.f32 %v1450_v42, 0.0 }
  0x1e   :  { %v1122_v46 = vld [vmem:[%s1752_s1 + $0x124] ss:$24 sps:$4 sm:$0xff]   ;;  %v231_v52 = vpack.c.bf16 %v163_v27, %v162_v20  ;;  %v1470_v56 = vld [vmem:[%s1751_s0 + $0x150] sm:$0xff]  ;;  %v73_v5 = vld [vmem:[%s1751_s0 + $0x1e8] sm:$0xff]  ;;  %v198_v10 = vmax.f32 %v102_v50, 0.0 }
  0x1f   :  { %913 = vmatpush3.bf16.msra.mxu0 %v210_v23  ;;  %1106 = vmatpush3.bf16.msra.mxu1 %v210_v23  ;;  %v83_v23 = vld [vmem:[%s1751_s0 + $0x238] sm:$0xff]  ;;  %v247_v53 = vpack.c.bf16 %v195_v29, %v194_v28  ;;  %v1480_v58 = vld [vmem:[%s1751_s0 + $0x250] sm:$0xff]  ;;  %v56_v14 = vld [vmem:[%s1751_s0 + $0x160] sm:$0xff] }
  0x20   :  { %914 = vmatprep.subr.bf16.mxu0 %v219_v30  ;;  %1099 = vmatprep.subr.bf16.mxu1 %v219_v30  ;;  %v68_v30 = vld [vmem:[%s1751_s0 + $0x1c0] sm:$0xff]  ;;  %v179_v39 = vmax.f32 %v83_v23, 0.0  ;;  %v1475_v57 = vld [vmem:[%s1751_s0 + $0x158] sm:$0xff]  ;;  %v57_v15 = vld [vmem:[%s1751_s0 + $0x168] sm:$0xff] }
  0x21   :  { %v164_v47 = vmax.f32 %v68_v30, 0.0  ;;  %v88_v20 = vld [vmem:[%s1751_s0 + $0x260] sm:$0xff]  ;;  %v1126_v23 = vld [vmem:[%s1752_s1 + $0x94] ss:$24 sps:$4 sm:$0xff]   ;;  %v75_v29 = vld [vmem:[%s1751_s0 + $0x1f8] sm:$0xff]  ;;  %v233_v30 = vpack.c.bf16 %v167_v9, %v166_v4 }
  0x22   :  { %v89_v27 = vld [vmem:[%s1751_s0 + $0x268] sm:$0xff]  ;;  %v74_v28 = vld [vmem:[%s1751_s0 + $0x1f0] sm:$0xff] }
  0x23   :  { %915 = vmatpush3.bf16.msra.mxu0 %v211_v33  ;;  %1107 = vmatpush3.bf16.msra.mxu1 %v211_v33  ;;  %v146_v33 = vmax.f32 %v50_v16, 0.0  ;;  %v232_v1 = vpack.c.bf16 %v165_v48, %v164_v47  ;;  %v106_v34 = vld [vmem:[%s1751_s0 + $0x2f0] sm:$0xff]  ;;  %v171_v47 = vmax.f32 %v75_v29, 0.0  ;;  %v1176_v29 = vld [vmem:[%s1752_s1 + $0x164] ss:$24 sps:$4 sm:$0xff]  }
  0x24   :  { %964 = vmatprep.subr.bf16.mxu1 %v228_v37  ;;  %1028 = vmatprep.subr.bf16.mxu0 %v244_v38  ;;  %v147_v37 = vmax.f32 %v51_v21, 0.0  ;;  %v178_v38 = vmax.f32 %v82_v22, 0.0  ;;  %v240_v21 = vpack.c.bf16 %v181_v3, %v180_v2  ;;  %v58_v40 = vld [vmem:[%s1751_s0 + $0x170] sm:$0xff]  ;;  %v202_v48 = vmax.f32 %v106_v34, 0.0  ;;  %v1132_v2 = vld [vmem:[%s1752_s1 + $0x8] ss:$24 sps:$4 sm:$0xff]  }
  0x25   :  { %v90_v50 = vld [vmem:[%s1751_s0 + $0x270] sm:$0xff] }
  0x26   :  { %573 = vmatmul.mubr.bf16.vlgmr.msra.gmra.mrb[0].mxu0 %v1108_v44  ;;  %605 = vmatmul.mubr.bf16.vlgmr.msra.gmra.mrb[0].mxu1 %v1111_v51  ;;  %v238_v44 = vpack.c.bf16 %v177_v19, %v176_v18  ;;  %v103_v51 = vld [vmem:[%s1751_s0 + $0x2d8] sm:$0xff]  ;;  %v223_v59 = vpack.c.bf16 %v147_v37, %v146_v33  ;;  %v239_v60 = vpack.c.bf16 %v179_v39, %v178_v38  ;;  %v151_v18 = vmax.f32 %v1475_v57, 0.0  ;;  %v1135_v3 = vld [vmem:[%s1752_s1 + $0x10] ss:$24 sps:$4 sm:$0xff]   ;;  %v1146_v9 = vld [vmem:[%s1752_s1 + $0x74] ss:$24 sps:$4 sm:$0xff]  }
  0x27   :  { %965 = vmatpush3.bf16.msra.mxu1 %v220_v61  ;;  %1029 = vmatpush3.bf16.msra.mxu0 %v236_v62  ;;  %v148_v61 = vmax.f32 %v52_v35, 0.0  ;;  %v149_v62 = vmax.f32 %v53_v36, 0.0  ;;  %v199_v11 = vmax.f32 %v103_v51, 0.0  ;;  %v182_v19 = vmax.f32 %v1480_v58, 0.0  ;;  %v107_v35 = vld [vmem:[%s1751_s0 + $0x2f8] sm:$0xff] }
  0x28   :  { %966 = vmatprep.subr.bf16.mxu1 %v229_v6  ;;  %1030 = vmatprep.subr.bf16.mxu0 %v245_v7  ;;  %v1124_v6 = vld [vmem:[%s1752_s1 + $0x60] ss:$24 sps:$4 sm:$0xff]   ;;  %v152_v36 = vmax.f32 %v56_v14, 0.0  ;;  %v153_v37 = vmax.f32 %v57_v15, 0.0  ;;  %v184_v38 = vmax.f32 %v88_v20, 0.0  ;;  %v185_v39 = vmax.f32 %v89_v27, 0.0 }
  0x29   :  { %580 = vmatprep.mubr.bf16.mxu0 %v1114_v63  ;;  %612 = vmatprep.mubr.bf16.mxu1 %v1116_v0  ;;  %v87_v63 = vld [vmem:[%s1751_s0 + $0x258] sm:$0xff]  ;;  %v72_v0 = vld [vmem:[%s1751_s0 + $0x1e0] sm:$0xff]  ;;  %v224_v16 = vpack.c.bf16 %v149_v62, %v148_v61  ;;  %v249_v31 = vpack.c.bf16 %v199_v11, %v198_v10  ;;  %v203_v49 = vmax.f32 %v107_v35, 0.0  ;;  %v186_v58 = vmax.f32 %v90_v50, 0.0  ;;  %v1149_v11 = vld [vmem:[%s1752_s1 + $0x70] ss:$24 sps:$4 sm:$0xff]  }
  0x2a   :  { %v1125_v7 = vld [vmem:[%s1752_s1 + $0x120] ss:$24 sps:$4 sm:$0xff]   ;;  %v183_v22 = vmax.f32 %v87_v63, 0.0  ;;  %v226_v54 = vpack.c.bf16 %v153_v37, %v152_v36  ;;  %v242_v55 = vpack.c.bf16 %v185_v39, %v184_v38  ;;  %v1134_v62 = vld [vmem:[%s1752_s1 + $0xc] ss:$24 sps:$4 sm:$0xff]  }
  0x2b   :  { %967 = vmatpush3.bf16.msra.mxu1 %v221_v12  ;;  %1031 = vmatpush3.bf16.msra.mxu0 %v237_v13  ;;  %v104_v12 = vld [vmem:[%s1751_s0 + $0x2e0] sm:$0xff]  ;;  %v105_v13 = vld [vmem:[%s1751_s0 + $0x2e8] sm:$0xff]  ;;  %v91_v51 = vld [vmem:[%s1751_s0 + $0x278] sm:$0xff]  ;;  %v251_v61 = vpack.c.bf16 %v203_v49, %v202_v48 }
  0x2c   :  { %968 = vmatprep.subr.bf16.mxu1 %v230_v17  ;;  %1032 = vmatprep.subr.bf16.mxu0 %v246_v26  ;;  %v150_v17 = vmax.f32 %v1470_v56, 0.0  ;;  %v169_v26 = vmax.f32 %v73_v5, 0.0  ;;  %v200_v32 = vmax.f32 %v104_v12, 0.0  ;;  %v201_v33 = vmax.f32 %v105_v13, 0.0  ;;  %v1137_v63 = vld [vmem:[%s1752_s1 + $0x14] ss:$24 sps:$4 sm:$0xff]  }
  0x2d   :  { %v241_v42 = vpack.c.bf16 %v183_v22, %v182_v19  ;;  %v154_v56 = vmax.f32 %v58_v40, 0.0  ;;  %v1138_v4 = vld [vmem:[%s1752_s1 + $0x3c] ss:$24 sps:$4 sm:$0xff]   ;;  %v1148_v10 = vld [vmem:[%s1752_s1 + $0x68] ss:$24 sps:$4 sm:$0xff]  }
  0x2e   :  { %581 = vmatmul.mubr.bf16.gmra.mrb[4].mxu0 %v1118_v24  ;;  %613 = vmatmul.mubr.bf16.gmra.mrb[4].mxu1 %v1119_v25  ;;  %v1128_v24 = vld [vmem:[%s1752_s1 + $0x154] ss:$24 sps:$4 sm:$0xff]   ;;  %v168_v25 = vmax.f32 %v72_v0, 0.0  ;;  %v225_v41 = vpack.c.bf16 %v151_v18, %v150_v17  ;;  %v1140_v5 = vld [vmem:[%s1752_s1 + $0x44] ss:$24 sps:$4 sm:$0xff]  }
  0x2f   :  { %969 = vmatpush3.bf16.msra.mxu1 %v222_v43  ;;  %1033 = vmatpush3.bf16.msra.mxu0 %v238_v44  ;;  %v170_v44 = vmax.f32 %v74_v28, 0.0  ;;  %v1150_v12 = vld [vmem:[%s1752_s1 + $0x9c] ss:$24 sps:$4 sm:$0xff]   ;;  %v1154_v14 = vld [vmem:[%s1752_s1 + $0x98] ss:$24 sps:$4 sm:$0xff]  }
  0x30   :  { %970 = vmatprep.subr.bf16.mxu1 %v231_v52  ;;  %1034 = vmatprep.subr.bf16.mxu0 %v247_v53  ;;  %v234_v43 = vpack.c.bf16 %v169_v26, %v168_v25  ;;  %v1130_v52 = vld [vmem:[%s1752_s1 + $0x90] ss:$24 sps:$4 sm:$0xff]   ;;  %v1152_v13 = vld [vmem:[%s1752_s1 + $0xa4] ss:$24 sps:$4 sm:$0xff]   ;;  %v1155_v15 = vld [vmem:[%s1752_s1 + $0xa0] ss:$24 sps:$4 sm:$0xff]  }
  0x31   :  { %588 = vmatprep.mubr.bf16.mxu0 %v1120_v45  ;;  %620 = vmatprep.mubr.bf16.mxu1 %v1122_v46  ;;  %v59_v45 = vld [vmem:[%s1751_s0 + $0x178] sm:$0xff]  ;;  %v250_v46 = vpack.c.bf16 %v201_v33, %v200_v32  ;;  %v1131_v53 = vld [vmem:[%s1752_s1 + $0x150] ss:$24 sps:$4 sm:$0xff]   ;;  %v1158_v17 = vld [vmem:[%s1752_s1 + $0xd4] ss:$24 sps:$4 sm:$0xff]  }
  0x32   :  { %v155_v57 = vmax.f32 %v59_v45, 0.0  ;;  %v1160_v18 = vld [vmem:[%s1752_s1 + $0xc8] ss:$24 sps:$4 sm:$0xff]   ;;  %v1162_v20 = vld [vmem:[%s1752_s1 + $0xfc] ss:$24 sps:$4 sm:$0xff]  }
  0x33   :  { %971 = vmatpush3.bf16.msra.mxu1 %v223_v59  ;;  %1035 = vmatpush3.bf16.msra.mxu0 %v239_v60  ;;  %v187_v59 = vmax.f32 %v91_v51, 0.0  ;;  %v235_v60 = vpack.c.bf16 %v171_v47, %v170_v44  ;;  %v1161_v19 = vld [vmem:[%s1752_s1 + $0xd0] ss:$24 sps:$4 sm:$0xff]   ;;  %v1170_v25 = vld [vmem:[%s1752_s1 + $0x134] ss:$24 sps:$4 sm:$0xff]  }
  0x34   :  { %972 = vmatprep.subr.bf16.mxu1 %v232_v1  ;;  %1036 = vmatprep.subr.bf16.mxu0 %v248_v8  ;;  %v227_v0 = vpack.c.bf16 %v155_v57, %v154_v56  ;;  %v1144_v8 = vld [vmem:[%s1752_s1 + $0x6c] ss:$24 sps:$4 sm:$0xff]   ;;  %v1166_v22 = vld [vmem:[%s1752_s1 + $0xf8] ss:$24 sps:$4 sm:$0xff]   ;;  %v1172_v26 = vld [vmem:[%s1752_s1 + $0x128] ss:$24 sps:$4 sm:$0xff]  }
  0x35   :  { %v243_v1 = vpack.c.bf16 %v187_v59, %v186_v58  ;;  %v1173_v27 = vld [vmem:[%s1752_s1 + $0x130] ss:$24 sps:$4 sm:$0xff]   ;;  %v1174_v28 = vld [vmem:[%s1752_s1 + $0x15c] ss:$24 sps:$4 sm:$0xff]  }
  0x36   :  { %589 = vmatmul.mubr.bf16.gmra.mrb[8].mxu0 %v1124_v6  ;;  %621 = vmatmul.mubr.bf16.gmra.mrb[8].mxu1 %v1125_v7  ;;  %v1142_v6 = vld [vmem:[%s1752_s1 + $0x38] ss:$24 sps:$4 sm:$0xff]  }
  0x37   :  { %973 = vmatpush3.bf16.msra.mxu1 %v224_v16  ;;  %1037 = vmatpush3.bf16.msra.mxu0 %v240_v21  ;;  %v1143_v7 = vld [vmem:[%s1752_s1 + $0x40] ss:$24 sps:$4 sm:$0xff]   ;;  %v1156_v16 = vld [vmem:[%s1752_s1 + $0xcc] ss:$24 sps:$4 sm:$0xff]  }
  0x38   :  { %974 = vmatprep.subr.bf16.mxu1 %v233_v30  ;;  %1038 = vmatprep.subr.bf16.mxu0 %v249_v31  ;;  %v1164_v21 = vld [vmem:[%s1752_s1 + $0x104] ss:$24 sps:$4 sm:$0xff]   ;;  %v1178_v30 = vld [vmem:[%s1752_s1 + $0x158] ss:$24 sps:$4 sm:$0xff]  }
  0x39   :  { %596 = vmatprep.mubr.bf16.mxu0 %v1126_v23  ;;  %628 = vmatprep.mubr.bf16.mxu1 %v1128_v24  ;;  %v1167_v23 = vld [vmem:[%s1752_s1 + $0x100] ss:$24 sps:$4 sm:$0xff]   ;;  %v1168_v24 = vld [vmem:[%s1752_s1 + $0x12c] ss:$24 sps:$4 sm:$0xff]  }
  0x3a   :  { %v1179_v31 = vld [vmem:[%s1752_s1 + $0x160] ss:$24 sps:$4 sm:$0xff]  }
  0x3b   :  { %975 = vmatpush3.bf16.msra.mxu1 %v225_v41  ;;  %1039 = vmatpush3.bf16.msra.mxu0 %v241_v42 }
  0x3c   :  { %976 = vmatprep.subr.bf16.mxu1 %v234_v43  ;;  %1040 = vmatprep.subr.bf16.mxu0 %v250_v46 }
  0x3e   :  { %597 = vmatmul.mubr.bf16.gmra.mrb[12].mxu0 %v1130_v52  ;;  %629 = vmatmul.mubr.bf16.gmra.mrb[12].mxu1 %v1131_v53 }
  0x3f   :  { %977 = vmatpush3.bf16.msra.mxu1 %v226_v54  ;;  %1041 = vmatpush3.bf16.msra.mxu0 %v242_v55 }
  0x40   :  { %978 = vmatprep.subr.bf16.mxu1 %v235_v60  ;;  %1042 = vmatprep.subr.bf16.mxu0 %v251_v61 }
  0x41   :  { %669 = vmatprep.mubr.bf16.mxu1 %v1134_v62  ;;  %766 = vmatprep.mubr.bf16.mxu0 %v1137_v63 }
  0x43   :  { %979 = vmatpush3.bf16.msra.mxu1 %v227_v0  ;;  %1043 = vmatpush3.bf16.msra.mxu0 %v243_v1 }
  0x46   :  { %670 = vmatmul.mubr.bf16.vlgmr.msra.gmra.mrb[16].mxu1 %v1132_v2  ;;  %767 = vmatmul.mubr.bf16.vlgmr.msra.gmra.mrb[16].mxu0 %v1135_v3 }
  0x47   :  { %677 = vmatprep.mubr.bf16.mxu1 %v1138_v4  ;;  %774 = vmatprep.mubr.bf16.mxu0 %v1140_v5 }
  0x4e   :  { %678 = vmatmul.mubr.bf16.gmra.mrb[20].mxu1 %v1142_v6  ;;  %775 = vmatmul.mubr.bf16.gmra.mrb[20].mxu0 %v1143_v7 }
  0x4f   :  { %685 = vmatprep.mubr.bf16.mxu1 %v1144_v8  ;;  %782 = vmatprep.mubr.bf16.mxu0 %v1146_v9 }
  0x56   :  { %686 = vmatmul.mubr.bf16.gmra.mrb[24].mxu1 %v1148_v10  ;;  %783 = vmatmul.mubr.bf16.gmra.mrb[24].mxu0 %v1149_v11 }
  0x57   :  { %693 = vmatprep.mubr.bf16.mxu1 %v1150_v12  ;;  %790 = vmatprep.mubr.bf16.mxu0 %v1152_v13 }
  0x5e   :  { %694 = vmatmul.mubr.bf16.gmra.mrb[28].mxu1 %v1154_v14  ;;  %791 = vmatmul.mubr.bf16.gmra.mrb[28].mxu0 %v1155_v15 }
  0x5f   :  { %701 = vmatprep.mubr.bf16.mxu1 %v1156_v16  ;;  %798 = vmatprep.mubr.bf16.mxu0 %v1158_v17 }
  0x66   :  { %702 = vmatmul.mubr.bf16.gmra.mrb[32].mxu1 %v1160_v18  ;;  %799 = vmatmul.mubr.bf16.gmra.mrb[32].mxu0 %v1161_v19 }
  0x67   :  { %709 = vmatprep.mubr.bf16.mxu1 %v1162_v20  ;;  %806 = vmatprep.mubr.bf16.mxu0 %v1164_v21 }
  0x6e   :  { %710 = vmatmul.mubr.bf16.gmra.mrb[36].mxu1 %v1166_v22  ;;  %807 = vmatmul.mubr.bf16.gmra.mrb[36].mxu0 %v1167_v23 }
  0x6f   :  { %717 = vmatprep.mubr.bf16.mxu1 %v1168_v24  ;;  %814 = vmatprep.mubr.bf16.mxu0 %v1170_v25 }
  0x76   :  { %718 = vmatmul.mubr.bf16.gmra.mrb[40].mxu1 %v1172_v26  ;;  %815 = vmatmul.mubr.bf16.gmra.mrb[40].mxu0 %v1173_v27 }
  0x77   :  { %725 = vmatprep.mubr.bf16.mxu1 %v1174_v28  ;;  %822 = vmatprep.mubr.bf16.mxu0 %v1176_v29 }
  0x7e   :  { %726 = vmatmul.mubr.bf16.gmra.mrb[44].mxu1 %v1178_v30  ;;  %823 = vmatmul.mubr.bf16.gmra.mrb[44].mxu0 %v1179_v31 }
  0xf9   :  { %v916_v32 = vpop.f32.mrb[0].mxu0  ;;  %v940_v33 = vpop.f32.mrb[0].mxu1 }
  0xfa   :  { %v917_v34 = vpop.f32.mrb[1].mxu0  ;;  %v941_v35 = vpop.f32.mrb[1].mxu1 }
  0xfb   :  { %v918_v36 = vadd.f32 %v917_v34, %v916_v32  ;;  %v1651_v37 = vadd.f32 %v941_v35, %v940_v33  ;;  %v919_v38 = vpop.f32.mrb[2].mxu0  ;;  %v943_v39 = vpop.f32.mrb[2].mxu1 }
  0xfc   :  { %v920_v40 = vpop.f32.mrb[3].mxu0  ;;  %v944_v41 = vpop.f32.mrb[3].mxu1 }
  0xfd   :  { %v921_v42 = vadd.f32 %v920_v40, %v919_v38  ;;  %v1653_v43 = vadd.f32 %v944_v41, %v943_v39 }
 0x101   :  { %v922_v44 = vpop.f32.mrb[4].mxu0  ;;  %v946_v45 = vpop.f32.mrb[4].mxu1 }
 0x102   :  { %v923_v46 = vpop.f32.mrb[5].mxu0  ;;  %v947_v47 = vpop.f32.mrb[5].mxu1 }
 0x103   :  { %v924_v48 = vadd.f32 %v923_v46, %v922_v44  ;;  %v1655_v49 = vadd.f32 %v947_v47, %v946_v45  ;;  %v925_v50 = vpop.f32.mrb[6].mxu0  ;;  %v949_v51 = vpop.f32.mrb[6].mxu1 }
 0x104   :  { %v926_v52 = vpop.f32.mrb[7].mxu0  ;;  %v950_v53 = vpop.f32.mrb[7].mxu1 }
 0x105   :  { %v927_v54 = vadd.f32 %v926_v52, %v925_v50  ;;  %v1657_v55 = vadd.f32 %v950_v53, %v949_v51 }
 0x109   :  { %v928_v56 = vpop.f32.mrb[8].mxu0  ;;  %v952_v57 = vpop.f32.mrb[8].mxu1 }
 0x10a   :  { %v929_v58 = vpop.f32.mrb[9].mxu0  ;;  %v953_v59 = vpop.f32.mrb[9].mxu1 }
 0x10b   :  { %v1659_v60 = vadd.f32 %v929_v58, %v928_v56  ;;  %v1661_v61 = vadd.f32 %v953_v59, %v952_v57  ;;  %v931_v62 = vpop.f32.mrb[10].mxu0  ;;  %v955_v63 = vpop.f32.mrb[10].mxu1 }
 0x10c   :  { %v932_v0 = vpop.f32.mrb[11].mxu0  ;;  %v956_v1 = vpop.f32.mrb[11].mxu1 }
 0x10d   :  { %v1663_v2 = vadd.f32 %v932_v0, %v931_v62  ;;  %v1665_v3 = vadd.f32 %v956_v1, %v955_v63 }
 0x111   :  { %v934_v4 = vpop.f32.mrb[12].mxu0  ;;  %v958_v5 = vpop.f32.mrb[12].mxu1 }
 0x112   :  { %v935_v6 = vpop.f32.mrb[13].mxu0  ;;  %v959_v7 = vpop.f32.mrb[13].mxu1 }
 0x113   :  { %v1667_v8 = vadd.f32 %v935_v6, %v934_v4  ;;  %v1669_v9 = vadd.f32 %v959_v7, %v958_v5  ;;  %v937_v10 = vpop.f32.mrb[14].mxu0  ;;  %v961_v11 = vpop.f32.mrb[14].mxu1 }
 0x114   :  { %v938_v12 = vpop.f32.mrb[15].mxu0  ;;  %v962_v13 = vpop.f32.mrb[15].mxu1 }
 0x115   :  { %v1671_v14 = vadd.f32 %v938_v12, %v937_v10  ;;  %v1673_v15 = vadd.f32 %v962_v13, %v961_v11 }
 0x119   :  { %v980_v16 = vpop.f32.mrb[16].mxu1  ;;  %v1044_v17 = vpop.f32.mrb[16].mxu0 }
 0x11a   :  { %v981_v18 = vpop.f32.mrb[17].mxu1  ;;  %v1045_v19 = vpop.f32.mrb[17].mxu0 }
 0x11b   :  { %v982_v20 = vadd.f32 %v981_v18, %v980_v16  ;;  %v1046_v21 = vadd.f32 %v1045_v19, %v1044_v17  ;;  %v983_v22 = vpop.f32.mrb[18].mxu1  ;;  %v1047_v23 = vpop.f32.mrb[18].mxu0 }
 0x11c   :  { %v984_v24 = vpop.f32.mrb[19].mxu1  ;;  %v1048_v25 = vpop.f32.mrb[19].mxu0 }
 0x11d   :  { %v672_v26 = vadd.f32 %v982_v20, %v918_v36  ;;  %v985_v27 = vadd.f32 %v984_v24, %v983_v22  ;;  %v1049_v28 = vadd.f32 %v1048_v25, %v1047_v23 }
 0x11f   :  { %v769_v29 = vadd.f32 %v1046_v21, %v672_v26  ;;  %v675_v30 = vadd.f32 %v985_v27, %v921_v42 }
 0x121   :  { %832 = vst.msk [vmem:[%s1753_s2] sm:$0xff] %vm831_vm0, %v769_v29  ;;  %v772_v31 = vadd.f32 %v1049_v28, %v675_v30  ;;  %v986_v32 = vpop.f32.mrb[20].mxu1  ;;  %v1050_v33 = vpop.f32.mrb[20].mxu0 }
 0x122   :  { %v987_v34 = vpop.f32.mrb[21].mxu1  ;;  %v1051_v35 = vpop.f32.mrb[21].mxu0 }
 0x123   :  { %833 = vst.msk [vmem:[%s1753_s2 + $0x8] sm:$0xff] %vm831_vm0, %v772_v31  ;;  %v988_v36 = vadd.f32 %v987_v34, %v986_v32  ;;  %v1052_v38 = vadd.f32 %v1051_v35, %v1050_v33  ;;  %v989_v39 = vpop.f32.mrb[22].mxu1  ;;  %v1053_v40 = vpop.f32.mrb[22].mxu0 }
 0x124   :  { %v990_v41 = vpop.f32.mrb[23].mxu1  ;;  %v1054_v42 = vpop.f32.mrb[23].mxu0 }
 0x125   :  { %v680_v44 = vadd.f32 %v988_v36, %v924_v48  ;;  %v991_v45 = vadd.f32 %v990_v41, %v989_v39  ;;  %v1055_v46 = vadd.f32 %v1054_v42, %v1053_v40 }
 0x127   :  { %v777_v47 = vadd.f32 %v1052_v38, %v680_v44  ;;  %v683_v50 = vadd.f32 %v991_v45, %v927_v54 }
 0x129   :  { %834 = vst.msk [vmem:[%s1753_s2 + $0x10] sm:$0xff] %vm831_vm0, %v777_v47  ;;  %v780_v51 = vadd.f32 %v1055_v46, %v683_v50  ;;  %v992_v52 = vpop.f32.mrb[24].mxu1  ;;  %v1056_v53 = vpop.f32.mrb[24].mxu0 }
 0x12a   :  { %v993_v56 = vpop.f32.mrb[25].mxu1  ;;  %v1057_v57 = vpop.f32.mrb[25].mxu0 }
 0x12b   :  { %835 = vst.msk [vmem:[%s1753_s2 + $0x18] sm:$0xff] %vm831_vm0, %v780_v51  ;;  %v994_v48 = vadd.f32 %v993_v56, %v992_v52  ;;  %v1058_v58 = vadd.f32 %v1057_v57, %v1056_v53  ;;  %v995_v59 = vpop.f32.mrb[26].mxu1  ;;  %v1059_v62 = vpop.f32.mrb[26].mxu0 }
 0x12c   :  { %v996_v54 = vpop.f32.mrb[27].mxu1  ;;  %v1060_v63 = vpop.f32.mrb[27].mxu0 }
 0x12d   :  { %v688_v0 = vadd.f32 %v994_v48, %v1659_v60  ;;  %v997_v1 = vadd.f32 %v996_v54, %v995_v59  ;;  %v1061_v4 = vadd.f32 %v1060_v63, %v1059_v62 }
 0x12f   :  { %v785_v5 = vadd.f32 %v1058_v58, %v688_v0  ;;  %v691_v6 = vadd.f32 %v997_v1, %v1663_v2 }
 0x131   :  { %836 = vst.msk [vmem:[%s1753_s2 + $0x20] sm:$0xff] %vm831_vm0, %v785_v5  ;;  %v788_v7 = vadd.f32 %v1061_v4, %v691_v6  ;;  %v998_v10 = vpop.f32.mrb[28].mxu1  ;;  %v1062_v11 = vpop.f32.mrb[28].mxu0 }
 0x132   :  { %v999_v12 = vpop.f32.mrb[29].mxu1  ;;  %v1063_v13 = vpop.f32.mrb[29].mxu0 }
 0x133   :  { %837 = vst.msk [vmem:[%s1753_s2 + $0x28] sm:$0xff] %vm831_vm0, %v788_v7  ;;  %v1000_v60 = vadd.f32 %v999_v12, %v998_v10  ;;  %v1064_v16 = vadd.f32 %v1063_v13, %v1062_v11  ;;  %v1001_v17 = vpop.f32.mrb[30].mxu1  ;;  %v1065_v18 = vpop.f32.mrb[30].mxu0 }
 0x134   :  { %v1002_v2 = vpop.f32.mrb[31].mxu1  ;;  %v1066_v19 = vpop.f32.mrb[31].mxu0 }
 0x135   :  { %v696_v20 = vadd.f32 %v1000_v60, %v1667_v8  ;;  %v1003_v21 = vadd.f32 %v1002_v2, %v1001_v17  ;;  %v1067_v22 = vadd.f32 %v1066_v19, %v1065_v18 }
 0x137   :  { %v793_v23 = vadd.f32 %v1064_v16, %v696_v20  ;;  %v699_v24 = vadd.f32 %v1003_v21, %v1671_v14 }
 0x139   :  { %838 = vst.msk [vmem:[%s1753_s2 + $0x30] sm:$0xff] %vm831_vm0, %v793_v23  ;;  %v796_v25 = vadd.f32 %v1067_v22, %v699_v24  ;;  %v1004_v26 = vpop.f32.mrb[32].mxu1  ;;  %v1068_v27 = vpop.f32.mrb[32].mxu0 }
 0x13a   :  { %v1005_v28 = vpop.f32.mrb[33].mxu1  ;;  %v1069_v29 = vpop.f32.mrb[33].mxu0 }
 0x13b   :  { %839 = vst.msk [vmem:[%s1753_s2 + $0x38] sm:$0xff] %vm831_vm0, %v796_v25  ;;  %v1006_v8 = vadd.f32 %v1005_v28, %v1004_v26  ;;  %v1070_v30 = vadd.f32 %v1069_v29, %v1068_v27  ;;  %v1007_v31 = vpop.f32.mrb[34].mxu1  ;;  %v1071_v32 = vpop.f32.mrb[34].mxu0 }
 0x13c   :  { %v1008_v14 = vpop.f32.mrb[35].mxu1  ;;  %v1072_v33 = vpop.f32.mrb[35].mxu0 }
 0x13d   :  { %v704_v34 = vadd.f32 %v1006_v8, %v1651_v37  ;;  %v1009_v35 = vadd.f32 %v1008_v14, %v1007_v31  ;;  %v1073_v36 = vadd.f32 %v1072_v33, %v1071_v32 }
 0x13f   :  { %v801_v38 = vadd.f32 %v1070_v30, %v704_v34  ;;  %v707_v39 = vadd.f32 %v1009_v35, %v1653_v43 }
 0x141   :  { %840 = vst.msk [vmem:[%s1753_s2 + $0x40] sm:$0xff] %vm831_vm0, %v801_v38  ;;  %v804_v40 = vadd.f32 %v1073_v36, %v707_v39  ;;  %v1010_v41 = vpop.f32.mrb[36].mxu1  ;;  %v1074_v42 = vpop.f32.mrb[36].mxu0 }
 0x142   :  { %v1011_v44 = vpop.f32.mrb[37].mxu1  ;;  %v1075_v45 = vpop.f32.mrb[37].mxu0 }
 0x143   :  { %841 = vst.msk [vmem:[%s1753_s2 + $0x48] sm:$0xff] %vm831_vm0, %v804_v40  ;;  %v1012_v37 = vadd.f32 %v1011_v44, %v1010_v41  ;;  %v1076_v46 = vadd.f32 %v1075_v45, %v1074_v42  ;;  %v1013_v47 = vpop.f32.mrb[38].mxu1  ;;  %v1077_v50 = vpop.f32.mrb[38].mxu0 }
 0x144   :  { %v1014_v43 = vpop.f32.mrb[39].mxu1  ;;  %v1078_v51 = vpop.f32.mrb[39].mxu0 }
 0x145   :  { %v712_v52 = vadd.f32 %v1012_v37, %v1655_v49  ;;  %v1015_v53 = vadd.f32 %v1014_v43, %v1013_v47  ;;  %v1079_v56 = vadd.f32 %v1078_v51, %v1077_v50 }
 0x147   :  { %v809_v57 = vadd.f32 %v1076_v46, %v712_v52  ;;  %v715_v48 = vadd.f32 %v1015_v53, %v1657_v55 }
 0x149   :  { %842 = vst.msk [vmem:[%s1753_s2 + $0x50] sm:$0xff] %vm831_vm0, %v809_v57  ;;  %v812_v58 = vadd.f32 %v1079_v56, %v715_v48  ;;  %v1016_v59 = vpop.f32.mrb[40].mxu1  ;;  %v1080_v62 = vpop.f32.mrb[40].mxu0 }
 0x14a   :  { %v1017_v54 = vpop.f32.mrb[41].mxu1  ;;  %v1081_v63 = vpop.f32.mrb[41].mxu0 }
 0x14b   :  { %843 = vst.msk [vmem:[%s1753_s2 + $0x58] sm:$0xff] %vm831_vm0, %v812_v58  ;;  %v1018_v49 = vadd.f32 %v1017_v54, %v1016_v59  ;;  %v1082_v0 = vadd.f32 %v1081_v63, %v1080_v62  ;;  %v1019_v1 = vpop.f32.mrb[42].mxu1  ;;  %v1083_v4 = vpop.f32.mrb[42].mxu0 }
 0x14c   :  { %v1020_v55 = vpop.f32.mrb[43].mxu1  ;;  %v1084_v5 = vpop.f32.mrb[43].mxu0 }
 0x14d   :  { %v720_v6 = vadd.f32 %v1018_v49, %v1661_v61  ;;  %v1021_v7 = vadd.f32 %v1020_v55, %v1019_v1  ;;  %v1085_v10 = vadd.f32 %v1084_v5, %v1083_v4 }
 0x14f   :  { %v817_v11 = vadd.f32 %v1082_v0, %v720_v6  ;;  %v723_v12 = vadd.f32 %v1021_v7, %v1665_v3 }
 0x151   :  { %844 = vst.msk [vmem:[%s1753_s2 + $0x60] sm:$0xff] %vm831_vm0, %v817_v11  ;;  %v820_v13 = vadd.f32 %v1085_v10, %v723_v12  ;;  %v1022_v60 = vpop.f32.mrb[44].mxu1  ;;  %v1086_v16 = vpop.f32.mrb[44].mxu0 }
 0x152   :  { %v1023_v17 = vpop.f32.mrb[45].mxu1  ;;  %v1087_v18 = vpop.f32.mrb[45].mxu0 }
 0x153   :  { %845 = vst.msk [vmem:[%s1753_s2 + $0x68] sm:$0xff] %vm831_vm0, %v820_v13  ;;  %v1024_v61 = vadd.f32 %v1023_v17, %v1022_v60  ;;  %v1088_v2 = vadd.f32 %v1087_v18, %v1086_v16  ;;  %v1025_v19 = vpop.f32.mrb[46].mxu1  ;;  %v1089_v20 = vpop.f32.mrb[46].mxu0 }
 0x154   :  { %v1026_v3 = vpop.f32.mrb[47].mxu1  ;;  %v1090_v21 = vpop.f32.mrb[47].mxu0 }
 0x155   :  { %v728_v22 = vadd.f32 %v1024_v61, %v1669_v9  ;;  %v1027_v23 = vadd.f32 %v1026_v3, %v1025_v19  ;;  %v1091_v24 = vadd.f32 %v1090_v21, %v1089_v20 }
 0x157   :  { %v825_v25 = vadd.f32 %v1088_v2, %v728_v22  ;;  %v731_v26 = vadd.f32 %v1027_v23, %v1673_v15 }
 0x159   :  { %846 = vst.msk [vmem:[%s1753_s2 + $0x70] sm:$0xff] %vm831_vm0, %v825_v25  ;;  %v828_v27 = vadd.f32 %v1091_v24, %v731_v26 }
 0x15b   :  { %847 = vst.msk [vmem:[%s1753_s2 + $0x78] sm:$0xff] %vm831_vm0, %v828_v27 }

</bundles_post_ra>
